<compile_context>
chip_gen: v7x
topology: tpu7x:2x2x1
jax: 0.10.0
libtpu: 0.0.40
codegen_flags: <defaults>
</compile_context>

<pallas_src>
import numpy as np
import jax
import jax.numpy as jnp
from jax.experimental import pallas as pl
from jax.experimental.pallas import tpu as pltpu

N_QUBITS = 4
N_LAYERS = 4
DIM = 2 ** N_QUBITS            # 16 statevector amplitudes
PATCHES = 7 * 7                # 49 2x2/stride-2 patches of a 14x14 image
FEATS = PATCHES * N_QUBITS     # 196
FEATS_PAD = 256                # fc1 contraction dim padded to a lane multiple
HID = 20
OUT = 10
HID_PAD = 128                  # fc1 width padded to full lanes
OUT_PAD = 128                  # fc2 width padded to full lanes
_INV_SQRT2 = 0.7071067811865476


def _round_up(x, m):
    return (x + m - 1) // m * m


def _bit(k, wire):
    # PennyLane default.qubit convention: wire 0 is the most significant bit.
    return (k >> (N_QUBITS - 1 - wire)) & 1


# --------------------------------------------------------------------------
# host-side parameter setup (numpy glue)
# --------------------------------------------------------------------------
def build_fixed_unitary(weights):
    """16x16 complex unitary of the weight-parameterised part of `circuit`."""
    U = np.eye(DIM, dtype=np.complex128)
    for layer in range(N_LAYERS):
        # ring of CRZ gates (diagonal)
        for i in range(N_QUBITS):
            ctrl, tgt = i, (i + 1) % N_QUBITS
            th = float(weights[layer, i])
            d = np.ones(DIM, dtype=np.complex128)
            for k in range(DIM):
                if _bit(k, ctrl) == 1:
                    d[k] = np.exp(-0.5j * th) if _bit(k, tgt) == 0 else np.exp(0.5j * th)
            U = d[:, None] * U
        # layer of RY gates
        for j in range(N_QUBITS, 2 * N_QUBITS):
            wire = j % N_QUBITS
            th = float(weights[layer, j])
            c, s = np.cos(th / 2.0), np.sin(th / 2.0)
            M = np.array([[c, -s], [s, c]], dtype=np.complex128)
            G = np.zeros((DIM, DIM), dtype=np.complex128)
            for k in range(DIM):
                for l in range(DIM):
                    if all(_bit(k, w) == _bit(l, w) for w in range(N_QUBITS) if w != wire):
                        G[k, l] = M[_bit(k, wire), _bit(l, wire)]
            U = G @ U
    return U


def build_packed_unitary(weights):
    """(32,32) real packing [[Ur,-Ui],[Ui,Ur]] so [fr;fi] = Up @ [ar;ai]."""
    U = build_fixed_unitary(weights)
    ur, ui = np.real(U), np.imag(U)
    top = np.concatenate([ur, -ui], axis=1)
    bot = np.concatenate([ui, ur], axis=1)
    return np.concatenate([top, bot], axis=0).astype(np.float32)


def build_zt2():
    """(4,32): PauliZ diagonals duplicated so ev = ZT2 @ [fr^2 ; fi^2]."""
    zt = np.zeros((N_QUBITS, DIM), dtype=np.float32)
    for w in range(N_QUBITS):
        for k in range(DIM):
            zt[w, k] = 1.0 - 2.0 * _bit(k, w)
    return np.concatenate([zt, zt], axis=1)


def build_gather_mats():
    """Constant selection matrices that move all replication/gather work
    from the VPU onto the MXU.

    In-kernel row layouts:
      cs   (8,T):  [c0, c1, c2, c3, s0, s1, s2, s3]        (c=cos(p/2), s=sin(p/2))
      sq   (8,T):  [A0r, A1r, B0r, B1r, A0i, A1i, B0i, B1i] (single-qubit amps)
      c_ri (8,T):  [C0r..C3r, C0i..C3i]  with C = kron(A, B)
      arai (32,T): [amp_r(16) ; amp_i(16)] with amp = kron(C, C)
    """
    k = _INV_SQRT2
    # preamp rows = [a0, a1, b0, b1] x2 ; a0=(c0-s0)k, a1=(c0+s0)k, b0=(c2-s2)k, b1=(c2+s2)k
    P2 = np.zeros((8, 8), np.float32)
    spec = [(0, 4, -1.0), (0, 4, +1.0), (2, 6, -1.0), (2, 6, +1.0)] * 2
    for r, (ci, si, sg) in enumerate(spec):
        P2[r, ci] = k
        P2[r, si] = sg * k
    # phase rows = [c1, c1, c3, c3, -s1, +s1, -s3, +s3]
    Q = np.zeros((8, 8), np.float32)
    spec = [(1, +1.0), (1, +1.0), (3, +1.0), (3, +1.0),
            (5, -1.0), (5, +1.0), (7, -1.0), (7, +1.0)]
    for r, (ci, sg) in enumerate(spec):
        Q[r, ci] = sg
    # C = kron(A,B): [Cr;Ci] = (SX@sq)*(SY@sq) summed over aligned halves.
    SX = np.zeros((16, 8), np.float32)
    SY = np.zeros((16, 8), np.float32)
    x1_cols = [0, 0, 1, 1, 0, 0, 1, 1]          # A_rep_r ; A_rep_r
    y1_cols = [2, 3, 2, 3, 6, 7, 6, 7]          # B_tile_r ; B_tile_i
    x2_cols = [4, 4, 5, 5, 4, 4, 5, 5]          # -A_rep_i ; +A_rep_i
    x2_sign = [-1, -1, -1, -1, +1, +1, +1, +1]
    y2_cols = [6, 7, 6, 7, 2, 3, 2, 3]          # B_tile_i ; B_tile_r
    for r in range(8):
        SX[r, x1_cols[r]] = 1.0
        SY[r, y1_cols[r]] = 1.0
        SX[8 + r, x2_cols[r]] = x2_sign[r]
        SY[8 + r, y2_cols[r]] = 1.0
    # amp = kron(C,C): arai = (TU@c_ri)*(TV@c_ri) summed over aligned halves.
    TU = np.zeros((64, 8), np.float32)
    TV = np.zeros((64, 8), np.float32)
    for i in range(4):
        for j in range(4):
            m = 4 * i + j
            TU[m, i] = 1.0            # Crep_r
            TU[16 + m, i] = 1.0       # Crep_r
            TU[32 + m, 4 + i] = -1.0  # -Crep_i
            TU[48 + m, 4 + i] = 1.0   # +Crep_i
            TV[m, j] = 1.0            # Ctile_r
            TV[16 + m, 4 + j] = 1.0   # Ctile_i
            TV[32 + m, 4 + j] = 1.0   # Ctile_i
            TV[48 + m, j] = 1.0       # Ctile_r
    return P2, Q, SX, SY, TU, TV


# --------------------------------------------------------------------------
# Pallas kernels
# --------------------------------------------------------------------------
def quanv_kernel(ang8_ref, p2_ref, q_ref, sx_ref, sy_ref, tu_ref, tv_ref,
                 up_ref, zt2_ref, out_ref):
    # ang8 rows 0-3 carry (patch + pi), rows 4-7 carry patch, so a single
    # full-density EUP sin yields cs = [cos(p/2) ; sin(p/2)].
    cs = jnp.sin(0.5 * ang8_ref[...])                                     # (8, T)

    # single-qubit amplitudes (only 2 distinct states: qubits {0,2}, {1,3})
    preamp = jnp.dot(p2_ref[...], cs, preferred_element_type=jnp.float32)
    phase = jnp.dot(q_ref[...], cs, preferred_element_type=jnp.float32)
    sq = preamp * phase                                                   # (8, T)

    # C = kron(A, B): one full-density complex multiply, vreg-aligned halves
    xs = jnp.dot(sx_ref[...], sq, preferred_element_type=jnp.float32)     # (16, T)
    ys = jnp.dot(sy_ref[...], sq, preferred_element_type=jnp.float32)     # (16, T)
    prod = xs * ys
    c_ri = prod[0:8, :] + prod[8:16, :]                                   # (8, T)

    # full statevector amp = kron(C, C) -> [amp_r(16) ; amp_i(16)]
    us = jnp.dot(tu_ref[...], c_ri, preferred_element_type=jnp.float32)   # (64, T)
    vs = jnp.dot(tv_ref[...], c_ri, preferred_element_type=jnp.float32)   # (64, T)
    prod2 = us * vs
    arai = prod2[0:32, :] + prod2[32:64, :]                               # (32, T)

    # fixed (weight-only) 16x16 complex unitary as ONE packed real matmul
    frfi = jnp.dot(up_ref[...], arai, preferred_element_type=jnp.float32)  # (32, T)

    # PauliZ expectations; the |.|^2 reduction is folded into zt2 = [zt, zt]
    sq_amp = frfi * frfi                                                   # (32, T)
    out_ref[...] = jnp.dot(zt2_ref[...], sq_amp,
                           preferred_element_type=jnp.float32)             # (4, T)


def mlp_kernel(x_ref, w1_ref, b1_ref, w2_ref, b2_ref, out_ref):
    h = jnp.dot(x_ref[...], w1_ref[...],
                preferred_element_type=jnp.float32) + b1_ref[...]
    h = jnp.maximum(h, 0.0)
    out_ref[...] = jnp.dot(h, w2_ref[...],
                           preferred_element_type=jnp.float32) + b2_ref[...]


# --------------------------------------------------------------------------
# pallas_call wrappers
# --------------------------------------------------------------------------
def quanv_forward(ang8, qmats, tile_r):
    n_pad = ang8.shape[1]
    grid = (n_pad // tile_r,)
    p2, q, sx, sy, tu, tv, up, zt2 = qmats
    ce = pl.CostEstimate(
        flops=int(n_pad) * 5400,
        transcendentals=int(n_pad) * 8,
        bytes_accessed=(12 * int(n_pad) + 1600) * 4,
    )

    def const_spec(shape):
        return pl.BlockSpec(shape, lambda i: (0, 0))      # resident

    return pl.pallas_call(
        quanv_kernel,
        out_shape=jax.ShapeDtypeStruct((N_QUBITS, n_pad), jnp.float32),
        grid=grid,
        in_specs=[
            pl.BlockSpec((8, tile_r), lambda i: (0, i)),
            const_spec((8, 8)), const_spec((8, 8)),
            const_spec((16, 8)), const_spec((16, 8)),
            const_spec((64, 8)), const_spec((64, 8)),
            const_spec((2 * DIM, 2 * DIM)), const_spec((N_QUBITS, 2 * DIM)),
        ],
        out_specs=pl.BlockSpec((N_QUBITS, tile_r), lambda i: (0, i)),
        compiler_params=pltpu.CompilerParams(
            dimension_semantics=("parallel",),
            vmem_limit_bytes=32 * 1024 * 1024,
        ),
        cost_estimate=ce,
    )(ang8, p2, q, sx, sy, tu, tv, up, zt2)


def mlp_forward(feats_padded, w1p, b1p, w2p, b2p, tile_b):
    bs_pad = feats_padded.shape[0]
    grid = (bs_pad // tile_b,)
    ce = pl.CostEstimate(
        flops=int(bs_pad) * (2 * FEATS_PAD * HID_PAD + 2 * HID_PAD * OUT_PAD),
        transcendentals=0,
        bytes_accessed=(int(bs_pad) * (FEATS_PAD + OUT_PAD)
                        + FEATS_PAD * HID_PAD + HID_PAD * OUT_PAD
                        + HID_PAD + OUT_PAD) * 4,
    )
    return pl.pallas_call(
        mlp_kernel,
        out_shape=jax.ShapeDtypeStruct((bs_pad, OUT_PAD), jnp.float32),
        grid=grid,
        in_specs=[
            pl.BlockSpec((tile_b, FEATS_PAD), lambda i: (i, 0)),
            pl.BlockSpec((FEATS_PAD, HID_PAD), lambda i: (0, 0)),   # resident
            pl.BlockSpec((1, HID_PAD), lambda i: (0, 0)),           # resident
            pl.BlockSpec((HID_PAD, OUT_PAD), lambda i: (0, 0)),     # resident
            pl.BlockSpec((1, OUT_PAD), lambda i: (0, 0)),           # resident
        ],
        out_specs=pl.BlockSpec((tile_b, OUT_PAD), lambda i: (i, 0)),
        compiler_params=pltpu.CompilerParams(
            dimension_semantics=("parallel",),
            vmem_limit_bytes=32 * 1024 * 1024,
        ),
        cost_estimate=ce,
    )(feats_padded, w1p, b1p, w2p, b2p)


# --------------------------------------------------------------------------
# forward pass (glue: patch extraction / layout / padding are plain JAX)
# --------------------------------------------------------------------------
def extract_patch_values(x):
    """x: (bs, 196) -> (bs, 49, 4): 2x2/stride-2 patches, torch.flatten order."""
    bs = x.shape[0]
    img = x.reshape(bs, 14, 14)
    return img.reshape(bs, 7, 2, 7, 2).transpose(0, 1, 3, 2, 4).reshape(bs, PATCHES, 4)


def _pick_row_tile(n, target=8192, min_tile=256):
    """Row tile: large enough to amortize grid-step overhead, >=2 grid steps
    when possible (v7x megacore), padding waste bounded."""
    if n <= min_tile:
        return min_tile
    half = _round_up((n + 1) // 2, min_tile)
    return int(min(target, half))


def net_forward(x, params):
    bs = x.shape[0]
    n = bs * PATCHES
    # lane-dense layout: patch values on sublanes, batch*patch rows on lanes
    ang = extract_patch_values(x).reshape(n, 4).T                       # (4, n)
    tile_r = _pick_row_tile(n)
    n_pad = _round_up(n, tile_r)
    ang = jnp.pad(ang, ((0, 0), (0, n_pad - n)))
    # rows 0-3: patch + pi (=> sin gives cos), rows 4-7: patch (=> sin)
    ang8 = jnp.concatenate([ang + np.float32(np.pi), ang], axis=0)      # (8, n_pad)

    ev = quanv_forward(ang8, params["qmats"], tile_r)                   # (4, n_pad)

    # feats[b, p*4+q] = ev[q, b*49+p]   (matches torch.cat(x_lst, dim=1))
    feats = ev[:, :n].T.reshape(bs, FEATS)
    feats = jnp.pad(feats, ((0, 0), (0, FEATS_PAD - FEATS)))            # K 196 -> 256

    tile_b = min(1024, _round_up(bs, 8))
    bs_pad = _round_up(bs, tile_b)
    feats = jnp.pad(feats, ((0, bs_pad - bs), (0, 0)))
    out = mlp_forward(feats, params["w1p"], params["b1p"],
                      params["w2p"], params["b2p"], tile_b)
    return out[:bs, :OUT]


# --------------------------------------------------------------------------
# independent numpy reference: gate-by-gate statevector sim of the PennyLane
# circuit + the literal Quanv2d/Net forward.
# --------------------------------------------------------------------------
_I2 = np.eye(2, dtype=np.complex128)
_H2 = np.array([[1, 1], [1, -1]], dtype=np.complex128) / np.sqrt(2.0)
_P0 = np.array([[1, 0], [0, 0]], dtype=np.complex128)
_P1 = np.array([[0, 0], [0, 1]], dtype=np.complex128)


def _ry_m(t):
    c, s = np.cos(t / 2.0), np.sin(t / 2.0)
    return np.array([[c, -s], [s, c]], dtype=np.complex128)


def _rz_m(t):
    return np.array([[np.exp(-0.5j * t), 0], [0, np.exp(0.5j * t)]], dtype=np.complex128)


def _embed(gates):
    M = np.array([[1.0 + 0j]])
    for w in range(N_QUBITS):
        M = np.kron(M, gates.get(w, _I2))
    return M


def _simulate_circuit_np(inputs, weights):
    state = np.zeros(DIM, dtype=np.complex128)
    state[0] = 1.0
    for q in range(N_QUBITS):
        state = _embed({q: _H2}) @ state
        state = _embed({q: _ry_m(inputs[2 * q])}) @ state
        state = _embed({q: _rz_m(inputs[2 * q + 1])}) @ state
    for layer in range(N_LAYERS):
        for i in range(N_QUBITS):
            c, t = i, (i + 1) % N_QUBITS
            M = _embed({c: _P0}) + _embed({c: _P1, t: _rz_m(weights[layer, i])})
            state = M @ state
        for j in range(N_QUBITS, 2 * N_QUBITS):
            state = _embed({j % N_QUBITS: _ry_m(weights[layer, j])}) @ state
    probs = np.abs(state) ** 2
    return np.array([float(np.dot(probs, np.array([1.0 - 2.0 * _bit(k, w)
                                                   for k in range(DIM)])))
                     for w in range(N_QUBITS)])


def net_reference_np(x, qweights, w1, b1, w2, b2):
    bs = x.shape[0]
    img = x.reshape(bs, 1, 14, 14)
    feats_cols = []
    for i in range(0, 14 - 2 + 1, 2):
        for j in range(0, 14 - 2 + 1, 2):
            patch = img[:, :, i:i + 2, j:j + 2].reshape(bs, -1)          # (bs, 4)
            inputs = np.concatenate([patch, patch], axis=1)[:, :2 * N_QUBITS]
            outs = np.stack([_simulate_circuit_np(inputs[b], qweights)
                             for b in range(bs)])                        # (bs, 4)
            feats_cols.append(outs)
    feats = np.concatenate(feats_cols, axis=1)                           # (bs, 196)
    h = np.maximum(feats @ w1 + b1, 0.0)
    return h @ w2 + b2


# --------------------------------------------------------------------------
if __name__ == "__main__":
    key = jax.random.PRNGKey(0)
    k_x, k_qw, k_w1, k_b1, k_w2, k_b2 = jax.random.split(key, 6)

    bs = 2
    x = jax.random.normal(k_x, (bs, 14 * 14), dtype=jnp.float32)

    qweights = np.asarray(jax.random.uniform(
        k_qw, (N_LAYERS, 2 * N_QUBITS), minval=0.0, maxval=2.0 * np.pi),
        dtype=np.float64)

    lim1 = 1.0 / np.sqrt(FEATS)
    lim2 = 1.0 / np.sqrt(float(HID))
    w1 = jax.random.uniform(k_w1, (FEATS, HID), jnp.float32, -lim1, lim1)
    b1 = jax.random.uniform(k_b1, (1, HID), jnp.float32, -lim1, lim1)
    w2 = jax.random.uniform(k_w2, (HID, OUT), jnp.float32, -lim2, lim2)
    b2 = jax.random.uniform(k_b2, (1, OUT), jnp.float32, -lim2, lim2)

    # zero-pad fc weights: K 196->256, widths to 128 lanes (sliced in wrapper)
    w1p = jnp.zeros((FEATS_PAD, HID_PAD), jnp.float32).at[:FEATS, :HID].set(w1)
    b1p = jnp.zeros((1, HID_PAD), jnp.float32).at[:, :HID].set(b1)
    w2p = jnp.zeros((HID_PAD, OUT_PAD), jnp.float32).at[:HID, :OUT].set(w2)
    b2p = jnp.zeros((1, OUT_PAD), jnp.float32).at[:, :OUT].set(b2)

    P2, Q, SX, SY, TU, TV = build_gather_mats()
    qmats = tuple(jnp.asarray(m) for m in
                  (P2, Q, SX, SY, TU, TV,
                   build_packed_unitary(qweights), build_zt2()))

    params = {
        "qmats": qmats,
        "w1p": w1p, "b1p": b1p, "w2p": w2p, "b2p": b2p,
    }

    out = jax.block_until_ready(jax.jit(net_forward)(x, params))
    assert out.shape == (bs, OUT), out.shape

    ref = net_reference_np(np.asarray(x, np.float64), qweights,
                           np.asarray(w1, np.float64), np.asarray(b1, np.float64),
                           np.asarray(w2, np.float64), np.asarray(b2, np.float64))

    np.testing.assert_allclose(np.asarray(out), ref, rtol=1e-2, atol=1e-2)
    print("KERNEL_OK")
</pallas_src>

<mosaic_0001>
module attributes {stable_mosaic.version = 11 : i64} {
  func.func @quanv_kernel(%arg0: i32, %arg1: memref<8x256xf32, #tpu.memory_space<vmem>>, %arg2: memref<8x8xf32, #tpu.memory_space<vmem>>, %arg3: memref<8x8xf32, #tpu.memory_space<vmem>>, %arg4: memref<16x8xf32, #tpu.memory_space<vmem>>, %arg5: memref<16x8xf32, #tpu.memory_space<vmem>>, %arg6: memref<64x8xf32, #tpu.memory_space<vmem>>, %arg7: memref<64x8xf32, #tpu.memory_space<vmem>>, %arg8: memref<32x32xf32, #tpu.memory_space<vmem>>, %arg9: memref<4x32xf32, #tpu.memory_space<vmem>>, %arg10: memref<4x256xf32, #tpu.memory_space<vmem>>) attributes {dimension_semantics = [#tpu.dimension_semantics<parallel>], iteration_bounds = array<i64: 1>, scalar_prefetch = 0 : i64, scratch_operands = 0 : i64, tpu.core_type = #tpu.core_type<tc>, window_params = [{transform_indices = @transform_0, window_bounds = array<i64: 8, 256>}, {pipeline_mode = #tpu.pipeline_mode<synchronous>, transform_indices = @transform_1, window_bounds = array<i64: 8, 8>}, {pipeline_mode = #tpu.pipeline_mode<synchronous>, transform_indices = @transform_2, window_bounds = array<i64: 8, 8>}, {pipeline_mode = #tpu.pipeline_mode<synchronous>, transform_indices = @transform_3, window_bounds = array<i64: 16, 8>}, {pipeline_mode = #tpu.pipeline_mode<synchronous>, transform_indices = @transform_4, window_bounds = array<i64: 16, 8>}, {pipeline_mode = #tpu.pipeline_mode<synchronous>, transform_indices = @transform_5, window_bounds = array<i64: 64, 8>}, {pipeline_mode = #tpu.pipeline_mode<synchronous>, transform_indices = @transform_6, window_bounds = array<i64: 64, 8>}, {pipeline_mode = #tpu.pipeline_mode<synchronous>, transform_indices = @transform_7, window_bounds = array<i64: 32, 32>}, {pipeline_mode = #tpu.pipeline_mode<synchronous>, transform_indices = @transform_8, window_bounds = array<i64: 4, 32>}, {transform_indices = @transform_9, window_bounds = array<i64: 4, 256>}]} {
    %c0 = arith.constant 0 : index
    %c0_0 = arith.constant 0 : index
    %0 = vector.load %arg1[%c0, %c0_0] : memref<8x256xf32, #tpu.memory_space<vmem>>, vector<8x256xf32>
    %cst = arith.constant 5.000000e-01 : f32
    %1 = vector.broadcast %cst : f32 to vector<8x256xf32>
    %2 = arith.mulf %1, %0 : vector<8x256xf32>
    %3 = math.sin %2 : vector<8x256xf32>
    %c0_1 = arith.constant 0 : index
    %c0_2 = arith.constant 0 : index
    %4 = vector.load %arg2[%c0_1, %c0_2] : memref<8x8xf32, #tpu.memory_space<vmem>>, vector<8x8xf32>
    %cst_3 = arith.constant dense<0.000000e+00> : vector<8x256xf32>
    %5 = tpu.matmul %4, %3, %cst_3 {dimension_numbers = #tpu.dot_dimension_numbers<[1], [0], [0], [1], [0, 0, 1, 1], [], []>} : vector<8x8xf32>, vector<8x256xf32>, vector<8x256xf32> -> vector<8x256xf32>
    %c0_4 = arith.constant 0 : index
    %c0_5 = arith.constant 0 : index
    %6 = vector.load %arg3[%c0_4, %c0_5] : memref<8x8xf32, #tpu.memory_space<vmem>>, vector<8x8xf32>
    %cst_6 = arith.constant dense<0.000000e+00> : vector<8x256xf32>
    %7 = tpu.matmul %6, %3, %cst_6 {dimension_numbers = #tpu.dot_dimension_numbers<[1], [0], [0], [1], [0, 0, 1, 1], [], []>} : vector<8x8xf32>, vector<8x256xf32>, vector<8x256xf32> -> vector<8x256xf32>
    %8 = arith.mulf %5, %7 : vector<8x256xf32>
    %c0_7 = arith.constant 0 : index
    %c0_8 = arith.constant 0 : index
    %9 = vector.load %arg4[%c0_7, %c0_8] : memref<16x8xf32, #tpu.memory_space<vmem>>, vector<16x8xf32>
    %cst_9 = arith.constant dense<0.000000e+00> : vector<16x256xf32>
    %10 = tpu.matmul %9, %8, %cst_9 {dimension_numbers = #tpu.dot_dimension_numbers<[1], [0], [0], [1], [0, 0, 1, 1], [], []>} : vector<16x8xf32>, vector<8x256xf32>, vector<16x256xf32> -> vector<16x256xf32>
    %c0_10 = arith.constant 0 : index
    %c0_11 = arith.constant 0 : index
    %11 = vector.load %arg5[%c0_10, %c0_11] : memref<16x8xf32, #tpu.memory_space<vmem>>, vector<16x8xf32>
    %cst_12 = arith.constant dense<0.000000e+00> : vector<16x256xf32>
    %12 = tpu.matmul %11, %8, %cst_12 {dimension_numbers = #tpu.dot_dimension_numbers<[1], [0], [0], [1], [0, 0, 1, 1], [], []>} : vector<16x8xf32>, vector<8x256xf32>, vector<16x256xf32> -> vector<16x256xf32>
    %13 = arith.mulf %10, %12 : vector<16x256xf32>
    %14 = vector.extract_strided_slice %13 {offsets = [0, 0], sizes = [8, 256], strides = [1, 1]} : vector<16x256xf32> to vector<8x256xf32>
    %15 = vector.extract_strided_slice %13 {offsets = [8, 0], sizes = [8, 256], strides = [1, 1]} : vector<16x256xf32> to vector<8x256xf32>
    %16 = arith.addf %14, %15 : vector<8x256xf32>
    %c0_13 = arith.constant 0 : index
    %c0_14 = arith.constant 0 : index
    %17 = vector.load %arg6[%c0_13, %c0_14] : memref<64x8xf32, #tpu.memory_space<vmem>>, vector<64x8xf32>
    %cst_15 = arith.constant dense<0.000000e+00> : vector<64x256xf32>
    %18 = tpu.matmul %17, %16, %cst_15 {dimension_numbers = #tpu.dot_dimension_numbers<[1], [0], [0], [1], [0, 0, 1, 1], [], []>} : vector<64x8xf32>, vector<8x256xf32>, vector<64x256xf32> -> vector<64x256xf32>
    %c0_16 = arith.constant 0 : index
    %c0_17 = arith.constant 0 : index
    %19 = vector.load %arg7[%c0_16, %c0_17] : memref<64x8xf32, #tpu.memory_space<vmem>>, vector<64x8xf32>
    %cst_18 = arith.constant dense<0.000000e+00> : vector<64x256xf32>
    %20 = tpu.matmul %19, %16, %cst_18 {dimension_numbers = #tpu.dot_dimension_numbers<[1], [0], [0], [1], [0, 0, 1, 1], [], []>} : vector<64x8xf32>, vector<8x256xf32>, vector<64x256xf32> -> vector<64x256xf32>
    %21 = arith.mulf %18, %20 : vector<64x256xf32>
    %22 = vector.extract_strided_slice %21 {offsets = [0, 0], sizes = [32, 256], strides = [1, 1]} : vector<64x256xf32> to vector<32x256xf32>
    %23 = vector.extract_strided_slice %21 {offsets = [32, 0], sizes = [32, 256], strides = [1, 1]} : vector<64x256xf32> to vector<32x256xf32>
    %24 = arith.addf %22, %23 : vector<32x256xf32>
    %c0_19 = arith.constant 0 : index
    %c0_20 = arith.constant 0 : index
    %25 = vector.load %arg8[%c0_19, %c0_20] : memref<32x32xf32, #tpu.memory_space<vmem>>, vector<32x32xf32>
    %cst_21 = arith.constant dense<0.000000e+00> : vector<32x256xf32>
    %26 = tpu.matmul %25, %24, %cst_21 {dimension_numbers = #tpu.dot_dimension_numbers<[1], [0], [0], [1], [0, 0, 1, 1], [], []>} : vector<32x32xf32>, vector<32x256xf32>, vector<32x256xf32> -> vector<32x256xf32>
    %27 = arith.mulf %26, %26 : vector<32x256xf32>
    %c0_22 = arith.constant 0 : index
    %c0_23 = arith.constant 0 : index
    %28 = vector.load %arg9[%c0_22, %c0_23] : memref<4x32xf32, #tpu.memory_space<vmem>>, vector<4x32xf32>
    %cst_24 = arith.constant dense<0.000000e+00> : vector<4x256xf32>
    %29 = tpu.matmul %28, %27, %cst_24 {dimension_numbers = #tpu.dot_dimension_numbers<[1], [0], [0], [1], [0, 0, 1, 1], [], []>} : vector<4x32xf32>, vector<32x256xf32>, vector<4x256xf32> -> vector<4x256xf32>
    %c0_25 = arith.constant 0 : index
    %c0_26 = arith.constant 0 : index
    %30 = vector.load %arg10[%c0_25, %c0_26] : memref<4x256xf32, #tpu.memory_space<vmem>>, vector<4x256xf32>
    tpu.vector_store %arg10[%c0_25, %c0_26], %29 {strides = array<i32>} : memref<4x256xf32, #tpu.memory_space<vmem>>, vector<4x256xf32>,
    return
  }
  func.func @transform_0(%arg0: i32) -> (i32, i32) {
    %c0_i32 = arith.constant 0 : i32
    %c0_i32_0 = arith.constant 0 : i32
    return %c0_i32, %arg0 : i32, i32
  }
  func.func @transform_1(%arg0: i32) -> (i32, i32) {
    %c0_i32 = arith.constant 0 : i32
    %c0_i32_0 = arith.constant 0 : i32
    %c0_i32_1 = arith.constant 0 : i32
    return %c0_i32, %c0_i32_0 : i32, i32
  }
  func.func @transform_2(%arg0: i32) -> (i32, i32) {
    %c0_i32 = arith.constant 0 : i32
    %c0_i32_0 = arith.constant 0 : i32
    %c0_i32_1 = arith.constant 0 : i32
    return %c0_i32, %c0_i32_0 : i32, i32
  }
  func.func @transform_3(%arg0: i32) -> (i32, i32) {
    %c0_i32 = arith.constant 0 : i32
    %c0_i32_0 = arith.constant 0 : i32
    %c0_i32_1 = arith.constant 0 : i32
    return %c0_i32, %c0_i32_0 : i32, i32
  }
  func.func @transform_4(%arg0: i32) -> (i32, i32) {
    %c0_i32 = arith.constant 0 : i32
    %c0_i32_0 = arith.constant 0 : i32
    %c0_i32_1 = arith.constant 0 : i32
    return %c0_i32, %c0_i32_0 : i32, i32
  }
  func.func @transform_5(%arg0: i32) -> (i32, i32) {
    %c0_i32 = arith.constant 0 : i32
    %c0_i32_0 = arith.constant 0 : i32
    %c0_i32_1 = arith.constant 0 : i32
    return %c0_i32, %c0_i32_0 : i32, i32
  }
  func.func @transform_6(%arg0: i32) -> (i32, i32) {
    %c0_i32 = arith.constant 0 : i32
    %c0_i32_0 = arith.constant 0 : i32
    %c0_i32_1 = arith.constant 0 : i32
    return %c0_i32, %c0_i32_0 : i32, i32
  }
  func.func @transform_7(%arg0: i32) -> (i32, i32) {
    %c0_i32 = arith.constant 0 : i32
    %c0_i32_0 = arith.constant 0 : i32
    %c0_i32_1 = arith.constant 0 : i32
    return %c0_i32, %c0_i32_0 : i32, i32
  }
  func.func @transform_8(%arg0: i32) -> (i32, i32) {
    %c0_i32 = arith.constant 0 : i32
    %c0_i32_0 = arith.constant 0 : i32
    %c0_i32_1 = arith.constant 0 : i32
    return %c0_i32, %c0_i32_0 : i32, i32
  }
  func.func @transform_9(%arg0: i32) -> (i32, i32) {
    %c0_i32 = arith.constant 0 : i32
    %c0_i32_0 = arith.constant 0 : i32
    return %c0_i32, %arg0 : i32, i32
  }
}

module attributes {stable_mosaic.version = 11 : i64} {
  func.func @mlp_kernel(%arg0: i32, %arg1: memref<8x256xf32, #tpu.memory_space<vmem>>, %arg2: memref<256x128xf32, #tpu.memory_space<vmem>>, %arg3: memref<1x128xf32, #tpu.memory_space<vmem>>, %arg4: memref<128x128xf32, #tpu.memory_space<vmem>>, %arg5: memref<1x128xf32, #tpu.memory_space<vmem>>, %arg6: memref<8x128xf32, #tpu.memory_space<vmem>>) attributes {dimension_semantics = [#tpu.dimension_semantics<parallel>], iteration_bounds = array<i64: 1>, scalar_prefetch = 0 : i64, scratch_operands = 0 : i64, tpu.core_type = #tpu.core_type<tc>, window_params = [{transform_indices = @transform_0, window_bounds = array<i64: 8, 256>}, {pipeline_mode = #tpu.pipeline_mode<synchronous>, transform_indices = @transform_1, window_bounds = array<i64: 256, 128>}, {pipeline_mode = #tpu.pipeline_mode<synchronous>, transform_indices = @transform_2, window_bounds = array<i64: 1, 128>}, {pipeline_mode = #tpu.pipeline_mode<synchronous>, transform_indices = @transform_3, window_bounds = array<i64: 128, 128>}, {pipeline_mode = #tpu.pipeline_mode<synchronous>, transform_indices = @transform_4, window_bounds = array<i64: 1, 128>}, {transform_indices = @transform_5, window_bounds = array<i64: 8, 128>}]} {
    %c0 = arith.constant 0 : index
    %c0_0 = arith.constant 0 : index
    %0 = vector.load %arg1[%c0, %c0_0] : memref<8x256xf32, #tpu.memory_space<vmem>>, vector<8x256xf32>
    %c0_1 = arith.constant 0 : index
    %c0_2 = arith.constant 0 : index
    %1 = vector.load %arg2[%c0_1, %c0_2] : memref<256x128xf32, #tpu.memory_space<vmem>>, vector<256x128xf32>
    %cst = arith.constant dense<0.000000e+00> : vector<8x128xf32>
    %2 = tpu.matmul %0, %1, %cst {dimension_numbers = #tpu.dot_dimension_numbers<[1], [0], [0], [1], [0, 0, 1, 1], [], []>} : vector<8x256xf32>, vector<256x128xf32>, vector<8x128xf32> -> vector<8x128xf32>
    %c0_3 = arith.constant 0 : index
    %c0_4 = arith.constant 0 : index
    %3 = vector.load %arg3[%c0_3, %c0_4] : memref<1x128xf32, #tpu.memory_space<vmem>>, vector<1x128xf32>
    %4 = vector.broadcast %3 : vector<1x128xf32> to vector<8x128xf32>
    %5 = arith.addf %2, %4 : vector<8x128xf32>
    %cst_5 = arith.constant 0.000000e+00 : f32
    %6 = vector.broadcast %cst_5 : f32 to vector<8x128xf32>
    %7 = arith.maximumf %5, %6 : vector<8x128xf32>
    %c0_6 = arith.constant 0 : index
    %c0_7 = arith.constant 0 : index
    %8 = vector.load %arg4[%c0_6, %c0_7] : memref<128x128xf32, #tpu.memory_space<vmem>>, vector<128x128xf32>
    %cst_8 = arith.constant dense<0.000000e+00> : vector<8x128xf32>
    %9 = tpu.matmul %7, %8, %cst_8 {dimension_numbers = #tpu.dot_dimension_numbers<[1], [0], [0], [1], [0, 0, 1, 1], [], []>} : vector<8x128xf32>, vector<128x128xf32>, vector<8x128xf32> -> vector<8x128xf32>
    %c0_9 = arith.constant 0 : index
    %c0_10 = arith.constant 0 : index
    %10 = vector.load %arg5[%c0_9, %c0_10] : memref<1x128xf32, #tpu.memory_space<vmem>>, vector<1x128xf32>
    %11 = vector.broadcast %10 : vector<1x128xf32> to vector<8x128xf32>
    %12 = arith.addf %9, %11 : vector<8x128xf32>
    %c0_11 = arith.constant 0 : index
    %c0_12 = arith.constant 0 : index
    %13 = vector.load %arg6[%c0_11, %c0_12] : memref<8x128xf32, #tpu.memory_space<vmem>>, vector<8x128xf32>
    tpu.vector_store %arg6[%c0_11, %c0_12], %12 {strides = array<i32>} : memref<8x128xf32, #tpu.memory_space<vmem>>, vector<8x128xf32>,
    return
  }
  func.func @transform_0(%arg0: i32) -> (i32, i32) {
    %c0_i32 = arith.constant 0 : i32
    %c0_i32_0 = arith.constant 0 : i32
    return %arg0, %c0_i32 : i32, i32
  }
  func.func @transform_1(%arg0: i32) -> (i32, i32) {
    %c0_i32 = arith.constant 0 : i32
    %c0_i32_0 = arith.constant 0 : i32
    %c0_i32_1 = arith.constant 0 : i32
    return %c0_i32, %c0_i32_0 : i32, i32
  }
  func.func @transform_2(%arg0: i32) -> (i32, i32) {
    %c0_i32 = arith.constant 0 : i32
    %c0_i32_0 = arith.constant 0 : i32
    %c0_i32_1 = arith.constant 0 : i32
    return %c0_i32, %c0_i32_0 : i32, i32
  }
  func.func @transform_3(%arg0: i32) -> (i32, i32) {
    %c0_i32 = arith.constant 0 : i32
    %c0_i32_0 = arith.constant 0 : i32
    %c0_i32_1 = arith.constant 0 : i32
    return %c0_i32, %c0_i32_0 : i32, i32
  }
  func.func @transform_4(%arg0: i32) -> (i32, i32) {
    %c0_i32 = arith.constant 0 : i32
    %c0_i32_0 = arith.constant 0 : i32
    %c0_i32_1 = arith.constant 0 : i32
    return %c0_i32, %c0_i32_0 : i32, i32
  }
  func.func @transform_5(%arg0: i32) -> (i32, i32) {
    %c0_i32 = arith.constant 0 : i32
    %c0_i32_0 = arith.constant 0 : i32
    return %arg0, %c0_i32 : i32, i32
  }
}

</mosaic_0001>

<bundles_post_ra>
// kernel: net_forward.3
= control target key start
LH: loop header
LB: loop body
LE: loop exit
PB: predicated region body
PF: predicated region fallthrough
CT: control target
= control target key end

     0   :  { %v378_v3 = vmov 0.0|0.0   ;;  %vm379_vm0 = vmmov 0   ;;  %s578_s1 = inlined_call_operand.vmem [shape: f32[256,128], index: 1, kind: input, shape index: {}]   ;;  %s579_s0 = inlined_call_operand.vmem [shape: f32[8,256], index: 0, kind: input, shape index: {}]   ;;  %s580_s3 = inlined_call_operand.vmem [shape: f32[128,128], index: 3, kind: input, shape index: {}]   ;;  %s581_s2 = inlined_call_operand.vmem [shape: f32[1,128], index: 2, kind: input, shape index: {}]   ;;  %s582_s4 = inlined_call_operand.vmem [shape: f32[1,128], index: 4, kind: input, shape index: {}]   ;;  %s583_s5 = inlined_call_operand.vmem [shape: f32[8,128], index: 5, kind: output, shape index: {}]  }
   0x1   :  { %v38_v0 = vld [vmem:[%s578_s1 + $0x80] sm:$0xff]  ;;  %v39_v1 = vld [vmem:[%s578_s1 + $0x88] sm:$0xff]  ;;  %351 = vmatprep.subr.bf16.mxu1 %v378_v3  ;;  %v40_v6 = vld [vmem:[%s578_s1 + $0x90] sm:$0xff] }
   0x2   :  { %v22_v2 = vld [vmem:[%s578_s1] sm:$0xff]  ;;  %v319_v4 = vpack.c.bf16 %v39_v1, %v38_v0  ;;  %v23_v5 = vld [vmem:[%s578_s1 + $0x8] sm:$0xff]  ;;  %v41_v7 = vld [vmem:[%s578_s1 + $0x98] sm:$0xff] }
   0x3   :  { %v321_v8 = vpack.c.bf16 %v23_v5, %v22_v2  ;;  %v323_v9 = vpack.c.bf16 %v41_v7, %v40_v6  ;;  %v24_v10 = vld [vmem:[%s578_s1 + $0x10] sm:$0xff]  ;;  %v25_v11 = vld [vmem:[%s578_s1 + $0x18] sm:$0xff]  ;;  %v42_v12 = vld [vmem:[%s578_s1 + $0xa0] sm:$0xff] }
   0x4   :  { %320 = vmatprep.subr.bf16.mxu0 %v319_v4  ;;  %v43_v13 = vld [vmem:[%s578_s1 + $0xa8] sm:$0xff]  ;;  %v325_v14 = vpack.c.bf16 %v25_v11, %v24_v10  ;;  %v26_v16 = vld [vmem:[%s578_s1 + $0x20] sm:$0xff]  ;;  %v44_v18 = vld [vmem:[%s578_s1 + $0xb0] sm:$0xff] }
   0x5   :  { %322 = vmatpush3.bf16.msra.mxu0 %v321_v8  ;;  %v327_v15 = vpack.c.bf16 %v43_v13, %v42_v12  ;;  %v27_v17 = vld [vmem:[%s578_s1 + $0x28] sm:$0xff]  ;;  %v45_v19 = vld [vmem:[%s578_s1 + $0xb8] sm:$0xff]  ;;  %v28_v22 = vld [vmem:[%s578_s1 + $0x30] sm:$0xff]  ;;  %v380_v12 = vmov 0.0  }
   0x6   :  { %324 = vmatprep.subr.bf16.mxu0 %v323_v9  ;;  %v329_v20 = vpack.c.bf16 %v27_v17, %v26_v16  ;;  %v331_v21 = vpack.c.bf16 %v45_v19, %v44_v18  ;;  %v29_v23 = vld [vmem:[%s578_s1 + $0x38] sm:$0xff]  ;;  %v46_v24 = vld [vmem:[%s578_s1 + $0xc0] sm:$0xff]  ;;  %v47_v25 = vld [vmem:[%s578_s1 + $0xc8] sm:$0xff]  ;;  %316 = vmatprep.mubr.msk.f32.mxu1 %vm379_vm0, %v380_v12 }
   0x7   :  { %v21_v26 = vld [vmem:[%s579_s0 + $0x8] sm:$0xff]  ;;  %v132_v27 = vld [vmem:[%s580_s3] sm:$0xff]  ;;  %v333_v29 = vpack.c.bf16 %v29_v23, %v28_v22  ;;  %v134_v31 = vld [vmem:[%s580_s3 + $0x10] sm:$0xff]  ;;  %v335_v33 = vpack.c.bf16 %v47_v25, %v46_v24 }
   0x8   :  { %125 = vmatprep.mubr.f32.mxu0 %v21_v26  ;;  %v133_v28 = vld [vmem:[%s580_s3 + $0x8] sm:$0xff]  ;;  %v135_v32 = vld [vmem:[%s580_s3 + $0x18] sm:$0xff]  ;;  %v30_v34 = vld [vmem:[%s578_s1 + $0x40] sm:$0xff] }
   0x9   :  { %326 = vmatpush3.bf16.msra.mxu0 %v325_v14  ;;  %v352_v30 = vpack.c.bf16 %v133_v28, %v132_v27  ;;  %v31_v35 = vld [vmem:[%s578_s1 + $0x48] sm:$0xff]  ;;  %v48_v36 = vld [vmem:[%s578_s1 + $0xd0] sm:$0xff]  ;;  %v49_v37 = vld [vmem:[%s578_s1 + $0xd8] sm:$0xff]  ;;  %v355_v38 = vpack.c.bf16 %v135_v32, %v134_v31 }
   0xa   :  { %328 = vmatprep.subr.bf16.mxu0 %v327_v15  ;;  %v136_v39 = vld [vmem:[%s580_s3 + $0x20] sm:$0xff]  ;;  %v137_v40 = vld [vmem:[%s580_s3 + $0x28] sm:$0xff]  ;;  %v337_v41 = vpack.c.bf16 %v31_v35, %v30_v34  ;;  %v339_v42 = vpack.c.bf16 %v49_v37, %v48_v36  ;;  %v32_v43 = vld [vmem:[%s578_s1 + $0x50] sm:$0xff] }
   0xb   :  { %353 = vmatpush3.bf16.msra.mxu1 %v352_v30  ;;  %v33_v44 = vld [vmem:[%s578_s1 + $0x58] sm:$0xff]  ;;  %v50_v45 = vld [vmem:[%s578_s1 + $0xe0] sm:$0xff]  ;;  %v51_v46 = vld [vmem:[%s578_s1 + $0xe8] sm:$0xff]  ;;  %v358_v47 = vpack.c.bf16 %v137_v40, %v136_v39 }
   0xc   :  { %354 = vmatprep.subr.bf16.mxu1 %v378_v3  ;;  %v138_v48 = vld [vmem:[%s580_s3 + $0x30] sm:$0xff]  ;;  %v139_v49 = vld [vmem:[%s580_s3 + $0x38] sm:$0xff]  ;;  %v341_v50 = vpack.c.bf16 %v33_v44, %v32_v43  ;;  %v343_v51 = vpack.c.bf16 %v51_v46, %v50_v45  ;;  %v34_v52 = vld [vmem:[%s578_s1 + $0x60] sm:$0xff] }
   0xd   :  { %330 = vmatpush3.bf16.msra.mxu0 %v329_v20  ;;  %v35_v53 = vld [vmem:[%s578_s1 + $0x68] sm:$0xff]  ;;  %v52_v54 = vld [vmem:[%s578_s1 + $0xf0] sm:$0xff]  ;;  %v53_v55 = vld [vmem:[%s578_s1 + $0xf8] sm:$0xff]  ;;  %v361_v56 = vpack.c.bf16 %v139_v49, %v138_v48 }
   0xe   :  { %332 = vmatprep.subr.bf16.mxu0 %v331_v21  ;;  %v140_v57 = vld [vmem:[%s580_s3 + $0x40] sm:$0xff]  ;;  %v141_v58 = vld [vmem:[%s580_s3 + $0x48] sm:$0xff]  ;;  %v345_v59 = vpack.c.bf16 %v35_v53, %v34_v52  ;;  %v347_v60 = vpack.c.bf16 %v53_v55, %v52_v54  ;;  %v36_v61 = vld [vmem:[%s578_s1 + $0x70] sm:$0xff] }
   0xf   :  { %356 = vmatpush3.bf16.msra.mxu1 %v355_v38  ;;  %v37_v62 = vld [vmem:[%s578_s1 + $0x78] sm:$0xff]  ;;  %v364_v63 = vpack.c.bf16 %v141_v58, %v140_v57  ;;  %v142_v0 = vld [vmem:[%s580_s3 + $0x50] sm:$0xff]  ;;  %v20_v5 = vld [vmem:[%s579_s0] sm:$0xff] }
  0x10   :  { %357 = vmatprep.subr.bf16.mxu1 %v378_v3  ;;  %v143_v1 = vld [vmem:[%s580_s3 + $0x58] sm:$0xff]  ;;  %v349_v2 = vpack.c.bf16 %v37_v62, %v36_v61  ;;  %v144_v6 = vld [vmem:[%s580_s3 + $0x60] sm:$0xff]  ;;  %v145_v7 = vld [vmem:[%s580_s3 + $0x68] sm:$0xff] }
  0x11   :  { %334 = vmatpush3.bf16.msra.mxu0 %v333_v29  ;;  %v367_v4 = vpack.c.bf16 %v143_v1, %v142_v0  ;;  %v370_v8 = vpack.c.bf16 %v145_v7, %v144_v6  ;;  %v146_v9 = vld [vmem:[%s580_s3 + $0x70] sm:$0xff]  ;;  %v147_v10 = vld [vmem:[%s580_s3 + $0x78] sm:$0xff]  ;;  %v230_v14 = vld [vmem:[%s581_s2] ss:$0 sm:$0xff] }
  0x12   :  { %336 = vmatprep.subr.bf16.mxu0 %v335_v33  ;;  %v373_v11 = vpack.c.bf16 %v147_v10, %v146_v9  ;;  %v231_v18 = vld [vmem:[%s582_s4] ss:$0 sm:$0xff] }
  0x13   :  { %359 = vmatpush3.bf16.msra.mxu1 %v358_v47 }
  0x14   :  { %360 = vmatprep.subr.bf16.mxu1 %v378_v3 }
  0x15   :  { %338 = vmatpush3.bf16.msra.mxu0 %v337_v41 }
  0x16   :  { %340 = vmatprep.subr.bf16.mxu0 %v339_v42 }
  0x17   :  { %362 = vmatpush3.bf16.msra.mxu1 %v361_v56 }
  0x18   :  { %363 = vmatprep.subr.bf16.mxu1 %v378_v3 }
  0x19   :  { %342 = vmatpush3.bf16.msra.mxu0 %v341_v50 }
  0x1a   :  { %344 = vmatprep.subr.bf16.mxu0 %v343_v51 }
  0x1b   :  { %365 = vmatpush3.bf16.msra.mxu1 %v364_v63 }
  0x1c   :  { %366 = vmatprep.subr.bf16.mxu1 %v378_v3 }
  0x1d   :  { %346 = vmatpush3.bf16.msra.mxu0 %v345_v59 }
  0x1e   :  { %348 = vmatprep.subr.bf16.mxu0 %v347_v60 }
  0x1f   :  { %368 = vmatpush3.bf16.msra.mxu1 %v367_v4 }
  0x20   :  { %369 = vmatprep.subr.bf16.mxu1 %v378_v3 }
  0x21   :  { %350 = vmatpush3.bf16.msra.mxu0 %v349_v2 }
  0x23   :  { %371 = vmatpush3.bf16.msra.mxu1 %v370_v8 }
  0x24   :  { %126 = vmatmul.mubr.f32.vlgmr.msra.gmra.mrb[0].mxu0 %v20_v5  ;;  %372 = vmatprep.subr.bf16.mxu1 %v378_v3 }
  0x27   :  { %374 = vmatpush3.bf16.msra.mxu1 %v373_v11 }
  0xf7   :  { %v264_v13 = vpop.f32.mrb[0].mxu0 }
  0xf8   :  { %v265_v15 = vpop.f32.mrb[1].mxu0 }
  0xf9   :  { %v266_v3 = vadd.f32 %v265_v15, %v264_v13 }
  0xfb   :  { %v128_v16 = vadd.f32 %v266_v3, %v230_v14 }
  0xfd   :  { %v131_v17 = vmax.f32 %v128_v16, 0.0 }
  0xff   :  { %317 = vmatmul.mubr.f32.vlgmr.msra.gmra.mrb[0].mxu1 %v131_v17 }
 0x1d2   :  { %v221_v19 = vpop.f32.mrb[0].mxu1 }
 0x1d3   :  { %v222_v20 = vadd.f32 %v231_v18, %v221_v19  ;;  %v318_v21 = vpop.f32.mrb[1].mxu1 }
 0x1d5   :  { %225 = vst [vmem:[%s583_s5] sm:$0xff] %v222_v20 }

// kernel: net_forward.2
= control target key start
LH: loop header
LB: loop body
LE: loop exit
PB: predicated region body
PF: predicated region fallthrough
CT: control target
= control target key end

     0   :  { %v1159_v4 = vmov 0.0   ;;  %v1160_v27 = vmov 683565275   ;;  %v1161_v29 = vmov 2475754826   ;;  %s1430_s0 = inlined_call_operand.vmem [shape: f32[8,256], index: 0, kind: input, shape index: {}]   ;;  %s1431_s1 = inlined_call_operand.vmem [shape: f32[8,8], index: 1, kind: input, shape index: {}]   ;;  %s1432_s2 = inlined_call_operand.vmem [shape: f32[8,8], index: 2, kind: input, shape index: {}]   ;;  %s1433_s3 = inlined_call_operand.vmem [shape: f32[16,8], index: 3, kind: input, shape index: {}]   ;;  %s1434_s4 = inlined_call_operand.vmem [shape: f32[16,8], index: 4, kind: input, shape index: {}]   ;;  %s1435_s5 = inlined_call_operand.vmem [shape: f32[64,8], index: 5, kind: input, shape index: {}]   ;;  %s1436_s6 = inlined_call_operand.vmem [shape: f32[64,8], index: 6, kind: input, shape index: {}]   ;;  %s1437_s7 = inlined_call_operand.vmem [shape: f32[32,32], index: 7, kind: input, shape index: {}]   ;;  %s1438_s8 = inlined_call_operand.vmem [shape: f32[4,32], index: 8, kind: input, shape index: {}]   ;;  %s1439_s9 = inlined_call_operand.vmem [shape: f32[4,256], index: 9, kind: output, shape index: {}]  }
   0x1   :  { %v33_v0 = vld [vmem:[%s1430_s0 + $0x8] sm:$0xff]  ;;  %v32_v1 = vld [vmem:[%s1430_s0] sm:$0xff]  ;;  %313 = vmatprep.mubr.f32.mxu1 %v1159_v4  ;;  %469 = vmatprep.mubr.f32.mxu0 %v1159_v4  ;;  %v1162_v31 = vmov 2131351028   ;;  %v1163_v33 = vmov 2102212464  }
   0x2   :  { %v1222_v2 = vmul.f32 0.5, %v33_v0  ;;  %v1224_v3 = vmul.f32 0.5, %v32_v1  ;;  %v1164_v35 = vmov 920167782   ;;  %v1165_v43 = vmov 1326507024  }
   0x4   :  { %v140_v5 = vand.u32 2147483647, %v1222_v2  ;;  %v143_v6 = vand.u32 2139095040, %v1222_v2  ;;  %v36_v7 = vand.u32 2147483647, %v1224_v3  ;;  %v39_v8 = vand.u32 2139095040, %v1224_v3 }
   0x5   :  { %vm142_vm14 = vcmp.lt.s32.totalorder %v1222_v2, 0 }
   0x6   :  { %v144_v9 = vshrl.u32 %v143_v6, 23  ;;  %v147_v10 = vand.u32 8388607, %v140_v5  ;;  %v40_v11 = vshrl.u32 %v39_v8, 23  ;;  %v43_v12 = vand.u32 8388607, %v36_v7 }
   0x7   :  { %vm141_vm15 = vcmp.le.f32.partialorder %v140_v5, 0.7853982 }
   0x8   :  { %v1089_v13 = vadd.s32 4294967169, %v144_v9  ;;  %v1085_v14 = vadd.s32 4294967169, %v40_v11  ;;  %v148_v16 = vor.u32 8388608, %v147_v10  ;;  %v44_v17 = vor.u32 8388608, %v43_v12 }
   0xa   :  { %v150_v15 = vadd.s32 1, %v1089_v13  ;;  %v46_v18 = vadd.s32 1, %v1085_v14  ;;  %v1236_v23 = vshll.u32 %v148_v16, 8  ;;  %v1238_v25 = vshll.u32 %v44_v17, 8 }
   0xc   :  { %vm151_vm0 = vcmp.gt.s32.totalorder %v150_v15, 0  ;;  %vm47_vm1 = vcmp.gt.s32.totalorder %v46_v18, 0 }
   0xd   :  { %v152_v19 = vsel %vm151_vm0, %v150_v15, 0  ;;  %v48_v22 = vsel %vm47_vm1, %v46_v18, 0  ;;  %vm38_vm0 = vcmp.lt.s32.totalorder %v1224_v3, 0  ;;  %vm37_vm1 = vcmp.le.f32.partialorder %v36_v7, 0.7853982 }
   0xe   :  { %v153_v20 = vshrl.u32 %v152_v19, 5  ;;  %v154_v21 = vand.u32 31, %v152_v19  ;;  %v50_v24 = vand.u32 31, %v48_v22  ;;  %v1240_v37 = vshrl.u32 %v48_v22, 5 }
  0x10   :  { %v155_v26 = vsub.s32 32, %v154_v21  ;;  %v157_v28 = vshll.u32 %v1160_v27, %v154_v21  ;;  %v160_v30 = vshll.u32 %v1161_v29, %v154_v21  ;;  %v163_v32 = vshll.u32 %v1162_v31, %v154_v21 }
  0x11   :  { %v166_v34 = vshll.u32 %v1163_v33, %v154_v21  ;;  %v169_v36 = vshll.u32 %v1164_v35, %v154_v21  ;;  %vm172_vm2 = vcmp.lt.s32.totalorder %v153_v20, 1  ;;  %vm173_vm3 = vcmp.lt.s32.totalorder %v153_v20, 2 }
  0x12   :  { %v156_v38 = vshrl.u32 %v1160_v27, %v155_v26  ;;  %v158_v39 = vshrl.u32 %v1161_v29, %v155_v26  ;;  %v161_v40 = vshrl.u32 %v1162_v31, %v155_v26  ;;  %v164_v41 = vshrl.u32 %v1163_v33, %v155_v26 }
  0x13   :  { %v167_v42 = vshrl.u32 %v1164_v35, %v155_v26  ;;  %v170_v44 = vshrl.u32 %v1165_v43, %v155_v26  ;;  %vm175_vm4 = vcmp.lt.s32.totalorder %v153_v20, 4  ;;  %v51_v48 = vsub.s32 32, %v50_v24 }
  0x14   :  { %v159_v45 = vor.u32 %v158_v39, %v157_v28  ;;  %v162_v46 = vor.u32 %v161_v40, %v160_v30  ;;  %v165_v47 = vor.u32 %v164_v41, %v163_v32  ;;  %vm174_vm5 = vcmp.lt.s32.totalorder %v153_v20, 3 }
  0x15   :  { %v168_v49 = vor.u32 %v167_v42, %v166_v34  ;;  %v171_v50 = vor.u32 %v170_v44, %v169_v36  ;;  %v53_v51 = vshll.u32 %v1160_v27, %v50_v24  ;;  %v56_v59 = vshll.u32 %v1161_v29, %v50_v24 }
  0x16   :  { %v176_v52 = vsel %vm172_vm2, %v156_v38, %v159_v45  ;;  %v177_v53 = vsel %vm175_vm4, %v165_v47, 2102212464  ;;  %v180_v54 = vsel %vm172_vm2, %v159_v45, %v162_v46  ;;  %v184_v55 = vsel %vm172_vm2, %v162_v46, %v165_v47 }
  0x17   :  { %v178_v56 = vsel %vm174_vm5, %v162_v46, %v177_v53  ;;  %v181_v57 = vsel %vm175_vm4, %v168_v49, 920167782  ;;  %v185_v58 = vsel %vm175_vm4, %v171_v50, 1326507024  ;;  %v52_v62 = vshrl.u32 %v1160_v27, %v51_v48 }
  0x18   :  { %v182_v60 = vsel %vm174_vm5, %v165_v47, %v181_v57  ;;  %v186_v61 = vsel %vm174_vm5, %v168_v49, %v185_v58  ;;  %v54_v63 = vshrl.u32 %v1161_v29, %v51_v48  ;;  %v179_v0 = vsel %vm173_vm3, %v176_v52, %v178_v56 }
  0x19   :  { %v183_v1 = vsel %vm173_vm3, %v180_v54, %v182_v60  ;;  %v187_v6 = vsel %vm173_vm3, %v184_v55, %v186_v61  ;;  %v57_v8 = vshrl.u32 %v1162_v31, %v51_v48  ;;  %v59_v15 = vshll.u32 %v1162_v31, %v50_v24 }
  0x1a   :  { %v1249_v9 = vmul.u32.u64.low %v1236_v23, %v187_v6  ;;  %v1250_v10 = vmul.u32.u64.high %v1236_v23, %v187_v6, %v1249_v9  ;;  %v1253_v11 = vmul.u32.u64.low %v1236_v23, %v183_v1  ;;  %v1254_v12 = vmul.u32.u64.high %v1236_v23, %v183_v1, %v1253_v11 }
  0x1b   :  { %v55_v13 = vor.u32 %v54_v63, %v53_v51  ;;  %v58_v14 = vor.u32 %v57_v8, %v56_v59  ;;  %v60_v16 = vshrl.u32 %v1163_v33, %v51_v48  ;;  %v62_v17 = vshll.u32 %v1163_v33, %v50_v24 }
  0x1c   :  { %v63_v18 = vshrl.u32 %v1164_v35, %v51_v48  ;;  %v65_v19 = vshll.u32 %v1164_v35, %v50_v24  ;;  %v66_v21 = vshrl.u32 %v1165_v43, %v51_v48  ;;  %v195_v20 = vmul.u32 %v1236_v23, %v179_v0 }
  0x1d   :  { %v61_v22 = vor.u32 %v60_v16, %v59_v15  ;;  %vm68_vm6 = vcmp.lt.s32.totalorder %v1240_v37, 1  ;;  %vm69_vm7 = vcmp.lt.s32.totalorder %v1240_v37, 2  ;;  %vm197_vm8 = vc.u32 %v1250_v10, %v1253_v11 }
  0x1e   :  { %v198_v26 = vadd.s32 1, %v1254_v12  ;;  %v64_v27 = vor.u32 %v63_v18, %v62_v17  ;;  %vm70_vm9 = vcmp.lt.s32.totalorder %v1240_v37, 3  ;;  %v67_v28 = vor.u32 %v66_v21, %v65_v19 }
  0x1f   :  { %vm71_vm10 = vcmp.lt.s32.totalorder %v1240_v37, 4  ;;  %v72_v29 = vsel %vm68_vm6, %v52_v62, %v55_v13  ;;  %v76_v24 = vsel %vm68_vm6, %v55_v13, %v58_v14  ;;  %v80_v32 = vsel %vm68_vm6, %v58_v14, %v61_v22 }
  0x20   :  { %v199_v30 = vsel %vm197_vm8, %v198_v26, %v1254_v12  ;;  %v73_v23 = vsel %vm71_vm10, %v61_v22, 2102212464  ;;  %v77_v31 = vsel %vm71_vm10, %v64_v27, 920167782  ;;  %v81_v36 = vsel %vm71_vm10, %v67_v28, 1326507024 }
  0x21   :  { %v200_v33 = vadd.s32 %v199_v30, %v195_v20  ;;  %v74_v34 = vsel %vm70_vm9, %v58_v14, %v73_v23  ;;  %v78_v35 = vsel %vm70_vm9, %v61_v22, %v77_v31  ;;  %v82_v40 = vsel %vm70_vm9, %v64_v27, %v81_v36 }
  0x22   :  { %v75_v38 = vsel %vm69_vm7, %v72_v29, %v74_v34  ;;  %v79_v39 = vsel %vm69_vm7, %v76_v24, %v78_v35  ;;  %v83_v42 = vsel %vm69_vm7, %v80_v32, %v82_v40  ;;  %v196_v61 = vadd.s32 %v1253_v11, %v1250_v10 }
  0x23   :  { %v201_v41 = vadd.s32 536870912, %v200_v33  ;;  %v1271_v43 = vmul.u32.u64.low %v1238_v25, %v79_v39  ;;  %v1272_v44 = vmul.u32.u64.high %v1238_v25, %v79_v39, %v1271_v43  ;;  %v91_v48 = vmul.u32 %v1238_v25, %v75_v38 }
  0x24   :  { %v1275_v45 = vmul.u32.u64.low %v1238_v25, %v83_v42  ;;  %v1276_v46 = vmul.u32.u64.high %v1238_v25, %v83_v42, %v1275_v45  ;;  %vm232_vm5 = vweird.f32 %v1222_v2  ;;  %vm128_vm9 = vweird.f32 %v1224_v3 }
  0x25   :  { %v202_v47 = vshrl.u32 %v201_v41, 30  ;;  %v94_v50 = vadd.s32 1, %v1272_v44  ;;  %vm245_vm10 = vcmask 64512  }
  0x26   :  { %vm93_vm11 = vc.u32 %v1276_v46, %v1271_v43  ;;  %v92_v18 = vadd.s32 %v1271_v43, %v1276_v46 }
  0x27   :  { %v203_v49 = vshll.u32 %v202_v47, 30  ;;  %v95_v37 = vsel %vm93_vm11, %v94_v50, %v1272_v44  ;;  %v226_v10 = vsub.s32 4, %v202_v47  ;;  %vm891_vm11 = vcmask 261120  }
  0x28   :  { %v96_v52 = vadd.s32 %v95_v37, %v91_v48 }
  0x29   :  { %v204_v51 = vsub.s32 %v200_v33, %v203_v49  ;;  %v227_v24 = vsel %vm142_vm14, %v226_v10, %v202_v47 }
  0x2a   :  { %v97_v54 = vadd.s32 536870912, %v96_v52  ;;  %v229_v33 = vsel %vm141_vm15, 0, %v227_v24  ;;  %v718_v24 = vld [vmem:[%s1436_s6] sm:$0xff] }
  0x2b   :  { %v206_v53 = vsub.s32 0, %v204_v51  ;;  %v233_v39 = vadd.s32 3, %v229_v33  ;;  %v576_v33 = vld [vmem:[%s1435_s5 + $0x18] sm:$0xff] }
  0x2c   :  { %v98_v56 = vshrl.u32 %v97_v54, 30 }
  0x2d   :  { %v1090_v55 = vmin.u32 %v206_v53, %v204_v51  ;;  %v234_v42 = vand.u32 3, %v233_v39  ;;  %v723_v39 = vld [vmem:[%s1436_s6 + $0x28] sm:$0xff] }
  0x2e   :  { %v99_v58 = vshll.u32 %v98_v56, 30  ;;  %v122_v38 = vsub.s32 4, %v98_v56 }
  0x2f   :  { %v208_v57 = vclz %v1090_v55  ;;  %vm239_vm2 = vcmp.eq.s32.totalorder %v234_v42, 2  ;;  %vm236_vm3 = vcmp.eq.s32.totalorder %v234_v42, 0  ;;  %vm235_vm4 = vcmp.lt.s32.totalorder %v234_v42, 2  ;;  %v725_v42 = vld [vmem:[%s1436_s6 + $0x38] sm:$0xff] }
  0x30   :  { %v100_v60 = vsub.s32 %v96_v52, %v99_v58  ;;  %v123_v41 = vsel %vm38_vm0, %v122_v38, %v98_v56  ;;  %v578_v38 = vld [vmem:[%s1435_s5 + $0x28] sm:$0xff] }
  0x31   :  { %v1091_v59 = vadd.s32 4294967294, %v208_v57  ;;  %v125_v45 = vsel %vm37_vm1, 0, %v123_v41  ;;  %v580_v41 = vld [vmem:[%s1435_s5 + $0x38] sm:$0xff] }
  0x32   :  { %v102_v62 = vsub.s32 0, %v100_v60  ;;  %v129_v49 = vadd.s32 3, %v125_v45 }
  0x33   :  { %vm1092_vm12 = vcmp.lt.s32.totalorder %v1091_v59, 0 }
  0x34   :  { %v211_v25 = vsel %vm1092_vm12, 0, %v1091_v59  ;;  %v1086_v6 = vmin.u32 %v102_v62, %v100_v60  ;;  %v130_v52 = vand.u32 3, %v129_v49 }
  0x35   :  { %v212_v63 = vsub.s32 32, %v211_v25  ;;  %v213_v0 = vshll.u32 %v204_v51, %v211_v25  ;;  %v216_v1 = vsub.s32 4294967266, %v211_v25 }
  0x36   :  { %v104_v12 = vclz %v1086_v6  ;;  %vm135_vm6 = vcmp.eq.s32.totalorder %v130_v52, 2  ;;  %vm132_vm7 = vcmp.eq.s32.totalorder %v130_v52, 0  ;;  %vm131_vm8 = vcmp.lt.s32.totalorder %v130_v52, 2 }
  0x37   :  { %v214_v8 = vshrl.u32 %v196_v61, %v212_v63  ;;  %v217_v9 = vadd.s32 127, %v216_v1 }
  0x38   :  { %v1087_v15 = vadd.s32 4294967294, %v104_v12  ;;  %v398_v12 = vld [vmem:[%s1433_s3 + $0x8] sm:$0xff] }
  0x39   :  { %v215_v13 = vor.u32 %v214_v8, %v213_v0  ;;  %v218_v14 = vshll.u32 %v217_v9, 23  ;;  %v397_v8 = vld [vmem:[%s1433_s3] sm:$0xff] }
  0x3a   :  { %vm1088_vm13 = vcmp.lt.s32.totalorder %v1087_v15, 0  ;;  %v482_v9 = vld [vmem:[%s1434_s4] sm:$0xff] }
  0x3b   :  { %v219_v16 = vor.u32 4788187, %v218_v14  ;;  %v222_v17 = vcvt.s32.f32 %v215_v13  ;;  %v107_v11 = vsel %vm1088_vm13, 0, %v1087_v15  ;;  %v483_v13 = vld [vmem:[%s1434_s4 + $0x8] sm:$0xff] }
  0x3c   :  { %v108_v21 = vsub.s32 32, %v107_v11  ;;  %v109_v20 = vshll.u32 %v100_v60, %v107_v11  ;;  %v112_v22 = vsub.s32 4294967266, %v107_v11 }
  0x3d   :  { %v220_v19 = vand.u32 2147483647, %v219_v16 }
  0x3e   :  { %v110_v27 = vshrl.u32 %v92_v18, %v108_v21  ;;  %v113_v28 = vadd.s32 127, %v112_v22 }
  0x3f   :  { %v223_v26 = vmul.f32 %v222_v17, %v220_v19 }
  0x40   :  { %v111_v30 = vor.u32 %v110_v27, %v109_v20  ;;  %v114_v23 = vshll.u32 %v113_v28, 23 }
  0x41   :  { %v224_v29 = vxor.u32 2147483648, %v223_v26 }
  0x42   :  { %v115_v34 = vor.u32 4788187, %v114_v23  ;;  %v118_v35 = vcvt.s32.f32 %v111_v30  ;;  %v574_v30 = vld [vmem:[%s1435_s5 + $0x8] sm:$0xff] }
  0x43   :  { %v225_v31 = vsel %vm142_vm14, %v224_v29, %v223_v26  ;;  %v573_v29 = vld [vmem:[%s1435_s5] sm:$0xff]  ;;  %v719_v23 = vld [vmem:[%s1436_s6 + $0x8] sm:$0xff] }
  0x44   :  { %v228_v32 = vsel %vm141_vm15, %v1222_v2, %v225_v31  ;;  %v116_v36 = vand.u32 2147483647, %v115_v34  ;;  %v244_v2 = vld [vmem:[%s1431_s1] sm:$0xff]  ;;  %v575_v31 = vld [vmem:[%s1435_s5 + $0x10] sm:$0xff]  ;;  %v721_v34 = vld [vmem:[%s1436_s6 + $0x18] sm:$0xff] }
  0x45   :  { %1151 = vcosq.f32 %v228_v32 }
  0x46   :  { %1153 = vsinq.f32 %v228_v32  ;;  %v119_v40 = vmul.f32 %v118_v35, %v116_v36  ;;  %v720_v32 = vld [vmem:[%s1436_s6 + $0x10] sm:$0xff]  ;;  %v577_v35 = vld [vmem:[%s1435_s5 + $0x20] sm:$0xff] }
  0x47   :  { %v722_v36 = vld [vmem:[%s1436_s6 + $0x20] sm:$0xff] }
  0x48   :  { %v120_v5 = vxor.u32 2147483648, %v119_v40 }
  0x4a   :  { %v121_v43 = vsel %vm38_vm0, %v120_v5, %v119_v40  ;;  %v579_v40 = vld [vmem:[%s1435_s5 + $0x30] sm:$0xff] }
  0x4b   :  { %v124_v44 = vsel %vm37_vm1, %v1224_v3, %v121_v43  ;;  %v320_v3 = vld [vmem:[%s1432_s2] sm:$0xff]  ;;  %v724_v5 = vld [vmem:[%s1436_s6 + $0x30] sm:$0xff] }
  0x4c   :  { %1155 = vcosq.f32 %v124_v44 }
  0x4d   :  { %1157 = vsinq.f32 %v124_v44 }
  0x4f   :  { %v1152_v46 = vpop.eup %1151 }
  0x50   :  { %v1154_v47 = vpop.eup %1153  ;;  %v240_v48 = vxor.u32 2147483648, %v1152_v46 }
  0x51   :  { %v237_v50 = vxor.u32 2147483648, %v1154_v47 }
  0x52   :  { %v241_v7 = vsel %vm239_vm2, %v240_v48, %v1154_v47 }
  0x53   :  { %v238_v51 = vsel %vm236_vm3, %v1152_v46, %v237_v50 }
  0x54   :  { %v242_v37 = vsel %vm235_vm4, %v238_v51, %v241_v7 }
  0x55   :  { %v243_v53 = vsel %vm232_vm5, nan, %v242_v37 }
  0x56   :  { %249 = vmatprep.subr.mxu1 %v243_v53  ;;  %v1156_v54 = vpop.eup %1155 }
  0x57   :  { %v1158_v55 = vpop.eup %1157  ;;  %v136_v56 = vxor.u32 2147483648, %v1156_v54 }
  0x58   :  { %v133_v57 = vxor.u32 2147483648, %v1158_v55 }
  0x59   :  { %v137_v58 = vsel %vm135_vm6, %v136_v56, %v1158_v55 }
  0x5a   :  { %v134_v59 = vsel %vm132_vm7, %v1156_v54, %v133_v57 }
  0x5b   :  { %v138_v60 = vsel %vm131_vm8, %v134_v59, %v137_v58 }
  0x5c   :  { %v139_v61 = vsel %vm128_vm9, nan, %v138_v60 }
  0x5d   :  { %250 = vmatpush1.msra.mxu1 %v139_v61 }
  0x5e   :  { %1093 = vmatmul.mubr.msk.f32.vlgmr.msra.gmra.mrb[0].mxu1 %vm245_vm10, %v244_v2  ;;  %324 = vmatprep.subr.mxu1 %v243_v53 }
  0x5f   :  { %325 = vmatpush1.msra.mxu1 %v139_v61  ;;  %388 = vmatprep.mubr.f32.mxu1 %v1159_v4 }
  0x62   :  { %1094 = vmatmul.mubr.msk.f32.vlgmr.msra.gmra.mrb[2].mxu1 %vm245_vm10, %v320_v3 }
  0x63   :  { %554 = vmatprep.mubr.f32.mxu1 %v1159_v4 }
 0x131   :  { %v315_v25 = vpop.f32.mrb[0].mxu1 }
 0x132   :  { %v317_v62 = vpop.f32.mrb[1].mxu1 }
 0x135   :  { %v390_v63 = vpop.f32.mrb[2].mxu1 }
 0x136   :  { %v395_v0 = vmul.f32 %v390_v63, %v315_v25  ;;  %v392_v1 = vpop.f32.mrb[3].mxu1 }
 0x137   :  { %v396_v6 = vmul.f32 %v392_v1, %v317_v62 }
 0x139   :  { %405 = vmatprep.subr.mxu0 %v396_v6  ;;  %490 = vmatprep.subr.mxu1 %v396_v6 }
 0x13a   :  { %406 = vmatpush1.msra.mxu0 %v395_v0  ;;  %491 = vmatpush1.msra.mxu1 %v395_v0 }
 0x13b   :  { %1095 = vmatmul.mubr.msk.f32.vlgmr.msra.gmra.mrb[0].mxu0 %vm245_vm10, %v397_v8  ;;  %1097 = vmatmul.mubr.msk.f32.vlgmr.msra.gmra.mrb[4].mxu1 %vm245_vm10, %v482_v9 }
 0x13c   :  { %475 = vmatprep.mubr.f32.mxu0 %v1159_v4  ;;  %560 = vmatprep.mubr.f32.mxu1 %v1159_v4 }
 0x13f   :  { %1096 = vmatmul.mubr.msk.f32.gmra.mrb[2].mxu0 %vm245_vm10, %v398_v12  ;;  %1098 = vmatmul.mubr.msk.f32.gmra.mrb[6].mxu1 %vm245_vm10, %v483_v13 }
 0x140   :  { %669 = vmatprep.mubr.f32.mxu0 %v1159_v4  ;;  %814 = vmatprep.mubr.f32.mxu1 %v1159_v4 }
 0x20e   :  { %v471_v14 = vpop.f32.mrb[0].mxu0  ;;  %v556_v15 = vpop.f32.mrb[4].mxu1 }
 0x20f   :  { %v567_v16 = vmul.f32 %v556_v15, %v471_v14  ;;  %v473_v17 = vpop.f32.mrb[1].mxu0  ;;  %v558_v18 = vpop.f32.mrb[5].mxu1 }
 0x210   :  { %v568_v19 = vmul.f32 %v558_v18, %v473_v17 }
 0x212   :  { %v477_v10 = vpop.f32.mrb[2].mxu0  ;;  %v562_v11 = vpop.f32.mrb[6].mxu1 }
 0x213   :  { %v569_v21 = vmul.f32 %v562_v11, %v477_v10  ;;  %v479_v20 = vpop.f32.mrb[3].mxu0  ;;  %v564_v22 = vpop.f32.mrb[7].mxu1 }
 0x214   :  { %v570_v26 = vmul.f32 %v564_v22, %v479_v20 }
 0x215   :  { %v571_v27 = vadd.f32 %v569_v21, %v567_v16 }
 0x216   :  { %v572_v28 = vadd.f32 %v570_v26, %v568_v19 }
 0x218   :  { %605 = vmatprep.subr.mxu0 %v572_v28  ;;  %750 = vmatprep.subr.mxu1 %v572_v28 }
 0x219   :  { %606 = vmatpush1.msra.mxu0 %v571_v27  ;;  %751 = vmatpush1.msra.mxu1 %v571_v27 }
 0x21a   :  { %1099 = vmatmul.mubr.msk.f32.vlgmr.msra.gmra.mrb[4].mxu0 %vm245_vm10, %v573_v29  ;;  %1107 = vmatmul.mubr.msk.f32.vlgmr.msra.gmra.mrb[8].mxu1 %vm245_vm10, %v718_v24 }
 0x21b   :  { %675 = vmatprep.mubr.f32.mxu0 %v1159_v4  ;;  %820 = vmatprep.mubr.f32.mxu1 %v1159_v4 }
 0x21e   :  { %1100 = vmatmul.mubr.msk.f32.gmra.mrb[6].mxu0 %vm245_vm10, %v574_v30  ;;  %1108 = vmatmul.mubr.msk.f32.gmra.mrb[10].mxu1 %vm245_vm10, %v719_v23 }
 0x21f   :  { %681 = vmatprep.mubr.f32.mxu0 %v1159_v4  ;;  %826 = vmatprep.mubr.f32.mxu1 %v1159_v4 }
 0x222   :  { %1101 = vmatmul.mubr.msk.f32.gmra.mrb[8].mxu0 %vm245_vm10, %v575_v31  ;;  %1109 = vmatmul.mubr.msk.f32.gmra.mrb[12].mxu1 %vm245_vm10, %v720_v32 }
 0x223   :  { %687 = vmatprep.mubr.f32.mxu0 %v1159_v4  ;;  %832 = vmatprep.mubr.f32.mxu1 %v1159_v4 }
 0x226   :  { %1102 = vmatmul.mubr.msk.f32.gmra.mrb[10].mxu0 %vm245_vm10, %v576_v33  ;;  %1110 = vmatmul.mubr.msk.f32.gmra.mrb[14].mxu1 %vm245_vm10, %v721_v34 }
 0x227   :  { %693 = vmatprep.mubr.f32.mxu0 %v1159_v4  ;;  %838 = vmatprep.mubr.f32.mxu1 %v1159_v4 }
 0x22a   :  { %1103 = vmatmul.mubr.msk.f32.gmra.mrb[12].mxu0 %vm245_vm10, %v577_v35  ;;  %1111 = vmatmul.mubr.msk.f32.gmra.mrb[16].mxu1 %vm245_vm10, %v722_v36 }
 0x22b   :  { %699 = vmatprep.mubr.f32.mxu0 %v1159_v4  ;;  %844 = vmatprep.mubr.f32.mxu1 %v1159_v4 }
 0x22e   :  { %1104 = vmatmul.mubr.msk.f32.gmra.mrb[14].mxu0 %vm245_vm10, %v578_v38  ;;  %1112 = vmatmul.mubr.msk.f32.gmra.mrb[18].mxu1 %vm245_vm10, %v723_v39 }
 0x22f   :  { %705 = vmatprep.mubr.f32.mxu0 %v1159_v4  ;;  %850 = vmatprep.mubr.f32.mxu1 %v1159_v4 }
 0x232   :  { %1105 = vmatmul.mubr.msk.f32.gmra.mrb[16].mxu0 %vm245_vm10, %v579_v40  ;;  %1113 = vmatmul.mubr.msk.f32.gmra.mrb[20].mxu1 %vm245_vm10, %v724_v5  ;;  %v887_v5 = vld [vmem:[%s1437_s7] sm:$0xff] }
 0x233   :  { %711 = vmatprep.mubr.f32.mxu0 %v1159_v4  ;;  %856 = vmatprep.mubr.f32.mxu1 %v1159_v4 }
 0x236   :  { %1106 = vmatmul.mubr.msk.f32.gmra.mrb[18].mxu0 %vm245_vm10, %v580_v41  ;;  %1114 = vmatmul.mubr.msk.f32.gmra.mrb[22].mxu1 %vm245_vm10, %v725_v42  ;;  %v888_v41 = vld [vmem:[%s1437_s7 + $0x8] sm:$0xff]  ;;  %v889_v42 = vld [vmem:[%s1437_s7 + $0x10] sm:$0xff] }
 0x237   :  { %968 = vmatprep.mubr.f32.mxu0 %v1159_v4  ;;  %1069 = vmatprep.mubr.f32.mxu1 %v1159_v4 }
 0x2ed   :  { %v671_v43 = vpop.f32.mrb[4].mxu0  ;;  %v816_v44 = vpop.f32.mrb[8].mxu1 }
 0x2ee   :  { %v863_v45 = vmul.f32 %v816_v44, %v671_v43  ;;  %v673_v46 = vpop.f32.mrb[5].mxu0  ;;  %v818_v47 = vpop.f32.mrb[9].mxu1  ;;  %v890_v43 = vld [vmem:[%s1437_s7 + $0x18] sm:$0xff] }
 0x2ef   :  { %v864_v48 = vmul.f32 %v818_v47, %v673_v46 }
 0x2f1   :  { %v677_v49 = vpop.f32.mrb[6].mxu0  ;;  %v822_v50 = vpop.f32.mrb[10].mxu1 }
 0x2f2   :  { %v865_v7 = vmul.f32 %v822_v50, %v677_v49  ;;  %v679_v51 = vpop.f32.mrb[7].mxu0  ;;  %v824_v37 = vpop.f32.mrb[11].mxu1 }
 0x2f3   :  { %v866_v52 = vmul.f32 %v824_v37, %v679_v51 }
 0x2f5   :  { %v683_v53 = vpop.f32.mrb[8].mxu0  ;;  %v828_v54 = vpop.f32.mrb[12].mxu1 }
 0x2f6   :  { %v867_v55 = vmul.f32 %v828_v54, %v683_v53  ;;  %v685_v56 = vpop.f32.mrb[9].mxu0  ;;  %v830_v57 = vpop.f32.mrb[13].mxu1 }
 0x2f7   :  { %v868_v58 = vmul.f32 %v830_v57, %v685_v56 }
 0x2f9   :  { %v689_v59 = vpop.f32.mrb[10].mxu0  ;;  %v834_v60 = vpop.f32.mrb[14].mxu1 }
 0x2fa   :  { %v869_v2 = vmul.f32 %v834_v60, %v689_v59  ;;  %v691_v61 = vpop.f32.mrb[11].mxu0  ;;  %v836_v3 = vpop.f32.mrb[15].mxu1 }
 0x2fb   :  { %v870_v25 = vmul.f32 %v836_v3, %v691_v61 }
 0x2fd   :  { %v695_v62 = vpop.f32.mrb[12].mxu0  ;;  %v840_v63 = vpop.f32.mrb[16].mxu1 }
 0x2fe   :  { %v871_v0 = vmul.f32 %v840_v63, %v695_v62  ;;  %v697_v1 = vpop.f32.mrb[13].mxu0  ;;  %v842_v6 = vpop.f32.mrb[17].mxu1 }
 0x2ff   :  { %v872_v8 = vmul.f32 %v842_v6, %v697_v1 }
 0x300   :  { %v879_v9 = vadd.f32 %v871_v0, %v863_v45 }
 0x301   :  { %v880_v12 = vadd.f32 %v872_v8, %v864_v48  ;;  %v701_v13 = vpop.f32.mrb[14].mxu0  ;;  %v846_v14 = vpop.f32.mrb[18].mxu1 }
 0x302   :  { %v873_v15 = vmul.f32 %v846_v14, %v701_v13  ;;  %v703_v16 = vpop.f32.mrb[15].mxu0  ;;  %v848_v17 = vpop.f32.mrb[19].mxu1 }
 0x303   :  { %v874_v18 = vmul.f32 %v848_v17, %v703_v16 }
 0x304   :  { %v881_v19 = vadd.f32 %v873_v15, %v865_v7 }
 0x305   :  { %v882_v10 = vadd.f32 %v874_v18, %v866_v52  ;;  %v707_v11 = vpop.f32.mrb[16].mxu0  ;;  %v852_v21 = vpop.f32.mrb[20].mxu1 }
 0x306   :  { %v1122_v20 = vpack.c.bf16 %v881_v19, %v879_v9  ;;  %v875_v22 = vmul.f32 %v852_v21, %v707_v11  ;;  %v709_v26 = vpop.f32.mrb[17].mxu0  ;;  %v854_v27 = vpop.f32.mrb[21].mxu1 }
 0x307   :  { %v876_v28 = vmul.f32 %v854_v27, %v709_v26  ;;  %v1120_v29 = vpack.c.bf16 %v882_v10, %v880_v12 }
 0x308   :  { %v883_v24 = vadd.f32 %v875_v22, %v867_v55 }
 0x309   :  { %v884_v30 = vadd.f32 %v876_v28, %v868_v58  ;;  %v713_v23 = vpop.f32.mrb[18].mxu0  ;;  %v858_v31 = vpop.f32.mrb[22].mxu1  ;;  %1121 = vmatprep.subr.bf16.mxu0 %v1120_v29 }
 0x30a   :  { %v877_v32 = vmul.f32 %v858_v31, %v713_v23  ;;  %v715_v33 = vpop.f32.mrb[19].mxu0  ;;  %v860_v34 = vpop.f32.mrb[23].mxu1  ;;  %1123 = vmatpush1.bf16.msra.mxu0 %v1122_v20 }
 0x30b   :  { %v878_v35 = vmul.f32 %v860_v34, %v715_v33 }
 0x30c   :  { %v885_v36 = vadd.f32 %v877_v32, %v869_v2  ;;  %v1001_v2 = vld [vmem:[%s1438_s8] sm:$0xf] }
 0x30d   :  { %v886_v38 = vadd.f32 %v878_v35, %v870_v25 }
 0x30e   :  { %v1126_v39 = vpack.c.bf16 %v885_v36, %v883_v24 }
 0x30f   :  { %v1124_v40 = vpack.c.bf16 %v886_v38, %v884_v30 }
 0x311   :  { %1125 = vmatprep.subr.bf16.mxu0 %v1124_v40 }
 0x312   :  { %1127 = vmatpush1.bf16.msra.mxu0 %v1126_v39 }
 0x315   :  { %1115 = vmatmul.mubr.msk.f32.vlgmr.msra.gmra.mrb[20].mxu0 %vm891_vm11, %v887_v5 }
 0x316   :  { %974 = vmatprep.mubr.f32.mxu0 %v1159_v4 }
 0x319   :  { %1116 = vmatmul.mubr.msk.f32.gmra.mrb[22].mxu0 %vm891_vm11, %v888_v41 }
 0x31a   :  { %980 = vmatprep.mubr.f32.mxu0 %v1159_v4 }
 0x31d   :  { %1117 = vmatmul.mubr.msk.f32.gmra.mrb[24].mxu0 %vm891_vm11, %v889_v42 }
 0x31e   :  { %986 = vmatprep.mubr.f32.mxu0 %v1159_v4 }
 0x321   :  { %1118 = vmatmul.mubr.msk.f32.gmra.mrb[26].mxu0 %vm891_vm11, %v890_v43 }
 0x3e8   :  { %v970_v44 = vpop.f32.mrb[20].mxu0 }
 0x3e9   :  { %v972_v45 = vpop.f32.mrb[21].mxu0  ;;  %v993_v47 = vmul.f32 %v970_v44, %v970_v44 }
 0x3ea   :  { %v994_v50 = vmul.f32 %v972_v45, %v972_v45 }
 0x3ec   :  { %v976_v46 = vpop.f32.mrb[22].mxu0 }
 0x3ed   :  { %v995_v48 = vmul.f32 %v976_v46, %v976_v46  ;;  %v978_v49 = vpop.f32.mrb[23].mxu0 }
 0x3ee   :  { %v996_v7 = vmul.f32 %v978_v49, %v978_v49 }
 0x3ef   :  { %v1130_v51 = vpack.c.bf16 %v995_v48, %v993_v47 }
 0x3f0   :  { %v1128_v37 = vpack.c.bf16 %v996_v7, %v994_v50  ;;  %v982_v52 = vpop.f32.mrb[24].mxu0 }
 0x3f1   :  { %v984_v53 = vpop.f32.mrb[25].mxu0  ;;  %v997_v54 = vmul.f32 %v982_v52, %v982_v52 }
 0x3f2   :  { %1129 = vmatprep.subr.bf16.mxu1 %v1128_v37  ;;  %v998_v57 = vmul.f32 %v984_v53, %v984_v53 }
 0x3f3   :  { %1131 = vmatpush1.bf16.msra.mxu1 %v1130_v51 }
 0x3f4   :  { %v988_v4 = vpop.f32.mrb[26].mxu0 }
 0x3f5   :  { %v999_v55 = vmul.f32 %v988_v4, %v988_v4  ;;  %v990_v56 = vpop.f32.mrb[27].mxu0 }
 0x3f6   :  { %v1000_v58 = vmul.f32 %v990_v56, %v990_v56 }
 0x3f7   :  { %v1134_v59 = vpack.c.bf16 %v999_v55, %v997_v54 }
 0x3f8   :  { %v1132_v60 = vpack.c.bf16 %v1000_v58, %v998_v57 }
 0x3fa   :  { %1133 = vmatprep.subr.bf16.mxu1 %v1132_v60 }
 0x3fb   :  { %1135 = vmatpush1.bf16.msra.mxu1 %v1134_v59 }
 0x3fe   :  { %1119 = vmatmul.mubr.msk.f32.vlgmr.msra.gmra.mrb[24].mxu1 %vm891_vm11, %v1001_v2 }
 0x4d1   :  { %v1071_v61 = vpop.f32.mrb[24].mxu1 }
 0x4d2   :  { %v1073_v3 = vpop.f32.mrb[25].mxu1 }
 0x4d3   :  { %v1078_v25 = vcombine.low %v1071_v61, %v1073_v3 }
 0x4d5   :  { %1080 = vst [vmem:[%s1439_s9] sm:$0xff] %v1078_v25 }

</bundles_post_ra>
